<compile_context>
chip_gen: v5e
topology: v5e:2x2
jax: 0.10.0
libtpu: 0.0.40
codegen_flags: <defaults>
</compile_context>

<pallas_src>
import functools

import jax
import jax.numpy as jnp
from jax import lax
from jax.experimental import pallas as pl
from jax.experimental.pallas import tpu as pltpu


def _round_up(x, m):
    return ((x + m - 1) // m) * m


def _pick_batch_tile(B, block_b):
    """Batch tile: lane/sublane aligned, <= B, >= 2 tiles for big batches."""
    cap = max(_round_up(block_b, 128), 128)
    if B >= 128:
        tb = min(cap, (B // 128) * 128)
        # Give v7x megacore (2 TensorCores) at least 2 grid steps to shard.
        if B >= 256 and pl.cdiv(B, tb) < 2:
            tb = max(128, (tb // 2) // 128 * 128)
    elif B >= 8:
        tb = (B // 8) * 8
    else:
        tb = max(B, 1)
    return tb


def qfunc_kernel(obs_ref, act_ref, w1a_ref, w1b_ref, b1_ref,
                 w2_ref, b2_ref, w3_ref, b3_ref, q_ref):
    # Layer 1: [obs, act] @ W1 + b1 without ever materializing the concat:
    # W1 is split into its obs/act row blocks, sum the two partial dots.
    # Cast streamed operands to the weight dtype in-kernel (bf16 MXU path).
    cdt = w1a_ref.dtype
    h1 = jnp.dot(obs_ref[...].astype(cdt), w1a_ref[...],
                 preferred_element_type=jnp.float32)
    h1 = h1 + jnp.dot(act_ref[...].astype(cdt), w1b_ref[...],
                      preferred_element_type=jnp.float32)
    h1 = jnp.maximum(h1 + b1_ref[...], 0.0)

    # Layer 2 (f32 accumulation; bias/ReLU stay f32 — safe on v5e's VPU).
    h2 = jnp.dot(h1.astype(w2_ref.dtype), w2_ref[...],
                 preferred_element_type=jnp.float32)
    h2 = jnp.maximum(h2 + b2_ref[...], 0.0)

    # Output layer (out dim = 1), produced lane-dense as a (1, TB) row:
    # q_row = w3_row @ h2^T via an NT dot_general (MXU is idle at these
    # shapes, so this tiny matmul is free and avoids lane-sparse stores).
    q_row = lax.dot_general(w3_ref[...], h2, (((1,), (1,)), ((), ())),
                            preferred_element_type=jnp.float32)
    q_ref[0] = (q_row + b3_ref[...]).astype(q_ref.dtype)


@functools.partial(jax.jit, static_argnames=("block_b", "use_bf16"))
def mlp_q_forward(obs, act, params, *, block_b=1024, use_bf16=False):
    """Runs the whole Q-function MLP as one batch-tiled Pallas kernel."""
    w1, b1, w2, b2, w3_row, b3 = params
    B, obs_dim = obs.shape
    act_dim = act.shape[1]
    d_in = obs_dim + act_dim
    h1_dim = w1.shape[1]
    h2_dim = w2.shape[1]

    # Split W1 into its obs/act row blocks instead of concatenating [obs, act]
    # in HBM (removes a full HBM read+write pass over the streamed operand).
    w1a = w1[:obs_dim]
    w1b = w1[obs_dim:]
    w2c = w2
    if use_bf16:  # weights are tiny; casting them in the wrapper is free.
        w1a = w1a.astype(jnp.bfloat16)
        w1b = w1b.astype(jnp.bfloat16)
        w2c = w2.astype(jnp.bfloat16)

    TB = _pick_batch_tile(B, block_b)
    num_tiles = pl.cdiv(B, TB)          # ragged trailing block, no jnp.pad

    def resident(arr):
        # Constant index map: loaded once, stays VMEM-resident across steps.
        return pl.BlockSpec(arr.shape, lambda i: (0, 0))

    in_specs = [
        pl.BlockSpec((TB, obs_dim), lambda i: (i, 0)),   # streamed obs tile
        pl.BlockSpec((TB, act_dim), lambda i: (i, 0)),   # streamed act tile
        resident(w1a), resident(w1b), resident(b1),
        resident(w2c), resident(b2), resident(w3_row), resident(b3),
    ]
    # Lane-dense output: one (1, 1, TB) row block per grid step.  The tiled
    # dim is kept outside the last two dims so the block equals the full
    # (1, TB) trailing dims (no sublane-unaligned blocks).
    out_specs = pl.BlockSpec((1, 1, TB), lambda i: (i, 0, 0))
    out_shape = jax.ShapeDtypeStruct((num_tiles, 1, TB), jnp.float32)

    rows = num_tiles * TB
    flops = 2 * rows * (d_in * h1_dim + h1_dim * h2_dim + h2_dim)
    param_elems = (w1a.size + w1b.size + b1.size + w2c.size + b2.size
                   + w3_row.size + b3.size)
    bytes_accessed = rows * d_in * 4 + rows * 4 + param_elems * 4

    # VMEM budget from actual sizes (double buffers for streamed operands and
    # residents), with generous headroom for compiler scratch.
    weight_itemsize = 2 if use_bf16 else 4
    vmem_needed = (2 * TB * (obs_dim + act_dim) * 4        # obs/act buffers
                   + 2 * TB * 4                            # output buffers
                   + 2 * ((w1a.size + w1b.size + w2c.size) * weight_itemsize
                          + (b1.size + b2.size + w3_row.size + b3.size) * 4))
    vmem_limit = int(min(64 * 2**20, max(8 * 2**20, 4 * vmem_needed)))

    q3d = pl.pallas_call(
        qfunc_kernel,
        out_shape=out_shape,
        grid=(num_tiles,),
        in_specs=in_specs,
        out_specs=out_specs,
        compiler_params=pltpu.CompilerParams(
            dimension_semantics=("parallel",),   # megacore sharding on v7x
            vmem_limit_bytes=vmem_limit,
        ),
        cost_estimate=pl.CostEstimate(
            flops=flops, transcendentals=0, bytes_accessed=bytes_accessed),
    )(obs, act, w1a, w1b, b1, w2c, b2, w3_row, b3)

    # (num_tiles, 1, TB) is contiguous in batch order: flatten, drop the
    # ragged tail, i.e. torch.squeeze(q, -1).
    return q3d.reshape(-1)[:B]


def init_params(key, obs_dim, act_dim, hidden_sizes):
    """Deterministic synthetic init for mlp([obs_dim+act_dim] + hidden + [1])."""
    h1, h2 = hidden_sizes
    d_in = obs_dim + act_dim
    k = jax.random.split(key, 6)
    s1 = 1.0 / jnp.sqrt(d_in)
    s2 = 1.0 / jnp.sqrt(h1)
    s3 = 1.0 / jnp.sqrt(h2)
    w1 = jax.random.uniform(k[0], (d_in, h1), jnp.float32, -s1, s1)
    b1 = jax.random.uniform(k[1], (1, h1), jnp.float32, -s1, s1)
    w2 = jax.random.uniform(k[2], (h1, h2), jnp.float32, -s2, s2)
    b2 = jax.random.uniform(k[3], (1, h2), jnp.float32, -s2, s2)
    w3_row = jax.random.uniform(k[4], (1, h2), jnp.float32, -s3, s3)  # out=1 as a row
    b3 = jax.random.uniform(k[5], (1, 1), jnp.float32, -s3, s3)
    return (w1, b1, w2, b2, w3_row, b3)


def reference_forward(obs, act, params):
    """Pure-JAX reference of the PyTorch module semantics."""
    w1, b1, w2, b2, w3_row, b3 = params
    x = jnp.concatenate([obs, act], axis=-1)
    h = jnp.maximum(x @ w1 + b1, 0.0)
    h = jnp.maximum(h @ w2 + b2, 0.0)
    q = h @ w3_row.T + b3
    return jnp.squeeze(q, -1)


if __name__ == "__main__":
    batch, obs_dim, act_dim = 8, 8, 4
    hidden_sizes = (32, 32)

    key = jax.random.PRNGKey(0)
    k_obs, k_act, k_par = jax.random.split(key, 3)
    obs = jax.random.normal(k_obs, (batch, obs_dim), jnp.float32)
    act = jax.random.normal(k_act, (batch, act_dim), jnp.float32)
    params = init_params(k_par, obs_dim, act_dim, hidden_sizes)

    q_expected = reference_forward(obs, act, params)

    # f32 path.
    q = mlp_q_forward(obs, act, params)
    jax.block_until_ready(q)
    assert q.shape == (batch,)
    assert jnp.allclose(q, q_expected, atol=2e-5, rtol=2e-5)

    # bf16-MXU path (f32 accumulation) — looser tolerance expected.
    q_bf16 = mlp_q_forward(obs, act, params, use_bf16=True)
    jax.block_until_ready(q_bf16)
    assert q_bf16.shape == (batch,)
    assert jnp.allclose(q_bf16, q_expected, atol=5e-2, rtol=5e-2)

    # Multi-tile path with a ragged trailing block (no wrapper pad).
    k2 = jax.random.PRNGKey(1)
    ko2, ka2 = jax.random.split(k2)
    obs2 = jax.random.normal(ko2, (300, obs_dim), jnp.float32)
    act2 = jax.random.normal(ka2, (300, act_dim), jnp.float32)
    q2 = mlp_q_forward(obs2, act2, params, block_b=1024)
    jax.block_until_ready(q2)
    q2_expected = reference_forward(obs2, act2, params)
    assert q2.shape == (300,)
    assert jnp.allclose(q2, q2_expected, atol=2e-5, rtol=2e-5)

    print("KERNEL_OK")
</pallas_src>

<mosaic_0001>
module attributes {stable_mosaic.version = 11 : i64} {
  func.func @qfunc_kernel(%arg0: i32, %arg1: memref<8x8xf32, #tpu.memory_space<vmem>>, %arg2: memref<8x4xf32, #tpu.memory_space<vmem>>, %arg3: memref<8x32xf32, #tpu.memory_space<vmem>>, %arg4: memref<4x32xf32, #tpu.memory_space<vmem>>, %arg5: memref<1x32xf32, #tpu.memory_space<vmem>>, %arg6: memref<32x32xf32, #tpu.memory_space<vmem>>, %arg7: memref<1x32xf32, #tpu.memory_space<vmem>>, %arg8: memref<1x32xf32, #tpu.memory_space<vmem>>, %arg9: memref<1x1xf32, #tpu.memory_space<vmem>>, %arg10: memref<1x1x8xf32, #tpu.memory_space<vmem>>) attributes {dimension_semantics = [#tpu.dimension_semantics<parallel>], iteration_bounds = array<i64: 1>, scalar_prefetch = 0 : i64, scratch_operands = 0 : i64, tpu.core_type = #tpu.core_type<tc>, window_params = [{transform_indices = @transform_0, window_bounds = array<i64: 8, 8>}, {transform_indices = @transform_1, window_bounds = array<i64: 8, 4>}, {pipeline_mode = #tpu.pipeline_mode<synchronous>, transform_indices = @transform_2, window_bounds = array<i64: 8, 32>}, {pipeline_mode = #tpu.pipeline_mode<synchronous>, transform_indices = @transform_3, window_bounds = array<i64: 4, 32>}, {pipeline_mode = #tpu.pipeline_mode<synchronous>, transform_indices = @transform_4, window_bounds = array<i64: 1, 32>}, {pipeline_mode = #tpu.pipeline_mode<synchronous>, transform_indices = @transform_5, window_bounds = array<i64: 32, 32>}, {pipeline_mode = #tpu.pipeline_mode<synchronous>, transform_indices = @transform_6, window_bounds = array<i64: 1, 32>}, {pipeline_mode = #tpu.pipeline_mode<synchronous>, transform_indices = @transform_7, window_bounds = array<i64: 1, 32>}, {pipeline_mode = #tpu.pipeline_mode<synchronous>, transform_indices = @transform_8, window_bounds = array<i64: 1, 1>}, {transform_indices = @transform_9, window_bounds = array<i64: 1, 1, 8>}]} {
    %c0 = arith.constant 0 : index
    %c0_0 = arith.constant 0 : index
    %0 = vector.load %arg1[%c0, %c0_0] : memref<8x8xf32, #tpu.memory_space<vmem>>, vector<8x8xf32>
    %c0_1 = arith.constant 0 : index
    %c0_2 = arith.constant 0 : index
    %1 = vector.load %arg3[%c0_1, %c0_2] : memref<8x32xf32, #tpu.memory_space<vmem>>, vector<8x32xf32>
    %cst = arith.constant dense<0.000000e+00> : vector<8x32xf32>
    %2 = tpu.matmul %0, %1, %cst {dimension_numbers = #tpu.dot_dimension_numbers<[1], [0], [0], [1], [0, 0, 1, 1], [], []>} : vector<8x8xf32>, vector<8x32xf32>, vector<8x32xf32> -> vector<8x32xf32>
    %c0_3 = arith.constant 0 : index
    %c0_4 = arith.constant 0 : index
    %3 = vector.load %arg2[%c0_3, %c0_4] : memref<8x4xf32, #tpu.memory_space<vmem>>, vector<8x4xf32>
    %c0_5 = arith.constant 0 : index
    %c0_6 = arith.constant 0 : index
    %4 = vector.load %arg4[%c0_5, %c0_6] : memref<4x32xf32, #tpu.memory_space<vmem>>, vector<4x32xf32>
    %cst_7 = arith.constant dense<0.000000e+00> : vector<8x32xf32>
    %5 = tpu.matmul %3, %4, %cst_7 {dimension_numbers = #tpu.dot_dimension_numbers<[1], [0], [0], [1], [0, 0, 1, 1], [], []>} : vector<8x4xf32>, vector<4x32xf32>, vector<8x32xf32> -> vector<8x32xf32>
    %6 = arith.addf %2, %5 : vector<8x32xf32>
    %c0_8 = arith.constant 0 : index
    %c0_9 = arith.constant 0 : index
    %7 = vector.load %arg5[%c0_8, %c0_9] : memref<1x32xf32, #tpu.memory_space<vmem>>, vector<1x32xf32>
    %8 = vector.broadcast %7 : vector<1x32xf32> to vector<8x32xf32>
    %9 = arith.addf %6, %8 : vector<8x32xf32>
    %cst_10 = arith.constant 0.000000e+00 : f32
    %10 = vector.broadcast %cst_10 : f32 to vector<8x32xf32>
    %11 = arith.maximumf %9, %10 : vector<8x32xf32>
    %c0_11 = arith.constant 0 : index
    %c0_12 = arith.constant 0 : index
    %12 = vector.load %arg6[%c0_11, %c0_12] : memref<32x32xf32, #tpu.memory_space<vmem>>, vector<32x32xf32>
    %cst_13 = arith.constant dense<0.000000e+00> : vector<8x32xf32>
    %13 = tpu.matmul %11, %12, %cst_13 {dimension_numbers = #tpu.dot_dimension_numbers<[1], [0], [0], [1], [0, 0, 1, 1], [], []>} : vector<8x32xf32>, vector<32x32xf32>, vector<8x32xf32> -> vector<8x32xf32>
    %c0_14 = arith.constant 0 : index
    %c0_15 = arith.constant 0 : index
    %14 = vector.load %arg7[%c0_14, %c0_15] : memref<1x32xf32, #tpu.memory_space<vmem>>, vector<1x32xf32>
    %15 = vector.broadcast %14 : vector<1x32xf32> to vector<8x32xf32>
    %16 = arith.addf %13, %15 : vector<8x32xf32>
    %cst_16 = arith.constant 0.000000e+00 : f32
    %17 = vector.broadcast %cst_16 : f32 to vector<8x32xf32>
    %18 = arith.maximumf %16, %17 : vector<8x32xf32>
    %c0_17 = arith.constant 0 : index
    %c0_18 = arith.constant 0 : index
    %19 = vector.load %arg8[%c0_17, %c0_18] : memref<1x32xf32, #tpu.memory_space<vmem>>, vector<1x32xf32>
    %cst_19 = arith.constant dense<0.000000e+00> : vector<1x8xf32>
    %20 = tpu.matmul %19, %18, %cst_19 {dimension_numbers = #tpu.dot_dimension_numbers<[1], [1], [0], [0], [0, 0, 1, 0], [], []>} : vector<1x32xf32>, vector<8x32xf32>, vector<1x8xf32> -> vector<1x8xf32>
    %c0_20 = arith.constant 0 : index
    %c0_21 = arith.constant 0 : index
    %21 = vector.load %arg9[%c0_20, %c0_21] : memref<1x1xf32, #tpu.memory_space<vmem>>, vector<1x1xf32>
    %22 = vector.broadcast %21 : vector<1x1xf32> to vector<1x8xf32>
    %23 = arith.addf %20, %22 : vector<1x8xf32>
    %c0_22 = arith.constant 0 : index
    %c0_23 = arith.constant 0 : index
    %c0_24 = arith.constant 0 : index
    %24 = vector.load %arg10[%c0_22, %c0_23, %c0_24] : memref<1x1x8xf32, #tpu.memory_space<vmem>>, vector<1x1x8xf32>
    %25 = vector.shape_cast %24 : vector<1x1x8xf32> to vector<1x8xf32>
    %26 = vector.shape_cast %23 : vector<1x8xf32> to vector<1x1x8xf32>
    tpu.vector_store %arg10[%c0_22, %c0_23, %c0_24], %26 {strides = array<i32>} : memref<1x1x8xf32, #tpu.memory_space<vmem>>, vector<1x1x8xf32>,
    return
  }
  func.func @transform_0(%arg0: i32) -> (i32, i32) {
    %c0_i32 = arith.constant 0 : i32
    %c0_i32_0 = arith.constant 0 : i32
    return %arg0, %c0_i32 : i32, i32
  }
  func.func @transform_1(%arg0: i32) -> (i32, i32) {
    %c0_i32 = arith.constant 0 : i32
    %c0_i32_0 = arith.constant 0 : i32
    return %arg0, %c0_i32 : i32, i32
  }
  func.func @transform_2(%arg0: i32) -> (i32, i32) {
    %c0_i32 = arith.constant 0 : i32
    %c0_i32_0 = arith.constant 0 : i32
    %c0_i32_1 = arith.constant 0 : i32
    return %c0_i32, %c0_i32_0 : i32, i32
  }
  func.func @transform_3(%arg0: i32) -> (i32, i32) {
    %c0_i32 = arith.constant 0 : i32
    %c0_i32_0 = arith.constant 0 : i32
    %c0_i32_1 = arith.constant 0 : i32
    return %c0_i32, %c0_i32_0 : i32, i32
  }
  func.func @transform_4(%arg0: i32) -> (i32, i32) {
    %c0_i32 = arith.constant 0 : i32
    %c0_i32_0 = arith.constant 0 : i32
    %c0_i32_1 = arith.constant 0 : i32
    return %c0_i32, %c0_i32_0 : i32, i32
  }
  func.func @transform_5(%arg0: i32) -> (i32, i32) {
    %c0_i32 = arith.constant 0 : i32
    %c0_i32_0 = arith.constant 0 : i32
    %c0_i32_1 = arith.constant 0 : i32
    return %c0_i32, %c0_i32_0 : i32, i32
  }
  func.func @transform_6(%arg0: i32) -> (i32, i32) {
    %c0_i32 = arith.constant 0 : i32
    %c0_i32_0 = arith.constant 0 : i32
    %c0_i32_1 = arith.constant 0 : i32
    return %c0_i32, %c0_i32_0 : i32, i32
  }
  func.func @transform_7(%arg0: i32) -> (i32, i32) {
    %c0_i32 = arith.constant 0 : i32
    %c0_i32_0 = arith.constant 0 : i32
    %c0_i32_1 = arith.constant 0 : i32
    return %c0_i32, %c0_i32_0 : i32, i32
  }
  func.func @transform_8(%arg0: i32) -> (i32, i32) {
    %c0_i32 = arith.constant 0 : i32
    %c0_i32_0 = arith.constant 0 : i32
    %c0_i32_1 = arith.constant 0 : i32
    return %c0_i32, %c0_i32_0 : i32, i32
  }
  func.func @transform_9(%arg0: i32) -> (i32, i32, i32) {
    %c0_i32 = arith.constant 0 : i32
    %c0_i32_0 = arith.constant 0 : i32
    %c0_i32_1 = arith.constant 0 : i32
    return %arg0, %c0_i32, %c0_i32_0 : i32, i32, i32
  }
}

</mosaic_0001>

<bundles_post_ra>
// kernel: mlp_q_forward.1
= control target key start
LH: loop header
LB: loop body
LE: loop exit
PB: predicated region body
PF: predicated region fallthrough
CT: control target
= control target key end

     0   :  { %s353_s0 = inlined_call_operand.hbm [shape: f32[8,8], index: 0, kind: input, shape index: {}]   ;;  %s354_s1 = inlined_call_operand.vmem [shape: f32[8,4], index: 1, kind: input, shape index: {}]   ;;  %s355_s2 = inlined_call_operand.vmem [shape: f32[8,32], index: 2, kind: input, shape index: {}]   ;;  %s356_s3 = inlined_call_operand.vmem [shape: f32[4,32], index: 3, kind: input, shape index: {}]   ;;  %s357_s4 = inlined_call_operand.vmem [shape: f32[1,32], index: 4, kind: input, shape index: {}]   ;;  %s358_s5 = inlined_call_operand.vmem [shape: f32[32,32], index: 5, kind: input, shape index: {}]   ;;  %s359_s6 = inlined_call_operand.vmem [shape: f32[1,32], index: 6, kind: input, shape index: {}]   ;;  %s360_s7 = inlined_call_operand.vmem [shape: f32[1,32], index: 7, kind: input, shape index: {}]   ;;  %s361_s8 = inlined_call_operand.<no memory space> [shape: f32[1,1], index: 8, kind: input, shape index: {}]   ;;  %s362_s9 = inlined_call_operand.hbm [shape: f32[1,1,8], index: 9, kind: output, shape index: {}]  }
   0x1   :  { %v14_v0 = vstv %s361_s8 }
   0x2   :  { %15 = vst [vmem:[#allocation2] sm:$0x1] %v14_v0 }
   0x3   :  { %16 = vsyncpa [#allocation4], 0 }
   0x4   :  { %17 = vsyncpa [#allocation5], 0  ;;  %s23_s13 = sshll.u32 %s353_s0, 4  ;;  %s261_s14 = smov [#allocation3]   ;;  %s24_s13 = int_to_ptr.hbm [resolvable:$true] %s23_s13 }
   0x5   :  { %s25_s15 = sshll.u32 %s261_s14, 4  ;;  %s26_s15 = int_to_ptr.vmem [resolvable:$true] %s25_s15 }
   0x6   :  { %28 = dma.hbm_to_vmem [thread:$0]  %s24_s13, 128, %s26_s15, [#allocation4]  }
   0x7   :  { %257 = dma.done.wait [#allocation4], 128  }
   0x8   :  { %258 = vsyncadd [#allocation4], 4294967168  ;;  %vm57_vm0 = vcmask 1043456   ;;  %vm53_vm1 = vcmask 31744   ;;  %vm81_vm2 = vcmask 64512   ;;  %v50_v2 = vld [vmem:[%s355_s2] sm:$0xff] }
   0x9   :  { %v52_v1 = vld [vmem:[%s356_s3] sm:$0xf]  ;;  %100 = vmatpush.msra.mxu1 %v50_v2  ;;  %v114_v5 = vld [vmem:[%s358_s5 + $0x18] sm:$0xff]  ;;  %v113_v6 = vld [vmem:[%s358_s5 + $0x10] sm:$0xff]  ;;  %vm119_vm3 = vcmask 261120   ;;  %v262_v16 = vmov 0  }
   0xa   :  { %v51_v3 = vld [vmem:[%s354_s1] sm:$0xff]  ;;  %197 = vmatpush.msk.msra.mxu0 %vm57_vm0, %v52_v1  ;;  %135 = vmatpush.msra.mxu2 %v114_v5  ;;  %v112_v7 = vld [vmem:[%s358_s5 + $0x8] sm:$0xff]  ;;  %s263_s29 = smov [#allocation6]   ;;  %s187_s12 = sshll.u32 %s362_s9, 4  ;;  %vm178_vm4 = vcmask 57344   ;;  %s188_s12 = int_to_ptr.hbm [resolvable:$true] %s187_s12 }
   0xb   :  { %v49_v4 = vld [vmem:[#allocation3] sm:$0xff]  ;;  %198 = vmatmul.msk.f32.vlgmr.msra.gmra.mxu0 %vm53_vm1, %v51_v3  ;;  %v207_v9 = vld [vmem:[%s357_s4] ss:$0 sm:$0xff]  ;;  %206 = vset.pattern.permute.xlu0 %v262_v16  ;;  %s185_s30 = sshll.u32 %s263_s29, 4  ;;  %s186_s30 = int_to_ptr.vmem [resolvable:$true] %s185_s30 }
   0xc   :  { %199 = vmatmul.msk.f32.vlgmr.msra.gmra.mxu1 %vm81_vm2, %v49_v4  ;;  %136 = vmatpush.msra.mxu2 %v113_v6  ;;  %v111_v8 = vld [vmem:[%s358_s5] sm:$0xff] }
   0xd   :  { %v145_v15 = vld [vmem:[#allocation2] sm:$0x1] }
   0xe   :  { %137 = vmatpush.msra.mxu2 %v112_v7  ;;  %148 = vperm.xlu0 %206, %v145_v15   ;;  %v208_v17 = vld [vmem:[%s359_s6] ss:$0 sm:$0xff] }
   0xf   :  { %v144_v21 = vld [vmem:[%s360_s7] sm:$0x1] }
  0x10   :  { %138 = vmatpush.msra.mxu2 %v111_v8 }
  0x80   :  { %v149_v22 = vpop.permute.xlu0 %148 }
  0x81   :  { %v151_v23 = vperm.slane %v149_v22, 0 }
  0x88   :  { %v78_v10 = vpop.f32.mrf.mxu0 }
  0x89   :  { %v102_v11 = vpop.f32.mrf.mxu1 }
  0x8a   :  { %v103_v12 = vadd.f32 %v102_v11, %v78_v10 }
  0x8c   :  { %v109_v13 = vadd.f32 %v207_v9, %v103_v12 }
  0x8e   :  { %v110_v14 = vmax.f32 %v109_v13, 0.0 }
  0x90   :  { %200 = vmatmul.msk.f32.vlgmr.msra.gmra.mxu2 %vm119_vm3, %v110_v14 }
 0x113   :  { %v140_v18 = vpop.f32.mrf.mxu2 }
 0x114   :  { %v141_v19 = vadd.f32 %v208_v17, %v140_v18 }
 0x116   :  { %v143_v20 = vmax.f32 %v141_v19, 0.0 }
 0x118   :  { %201 = vmatpush.xpose.msk.msra.mxu3 %vm119_vm3, %v143_v20 }
 0x11b   :  { %202 = vmatmul.msk.f32.vlgmr.msra.gmra.mxu3 %vm119_vm3, %v144_v21 }
 0x19e   :  { %v175_v24 = vpop.f32.mrf.mxu3 }
 0x19f   :  { %v176_v25 = vadd.f32 %v175_v24, %v151_v23 }
 0x1a1   :  { %179 = vst.msk [vmem:[#allocation6] sm:$0x1] %vm178_vm4, %v176_v25 }
 0x1a2   :  { %190 = dma.vmem_to_hbm [thread:$0]  %s186_s30, 16, %s188_s12, [#allocation5]  }
 0x1a3   :  { %259 = dma.done.wait [#allocation5], 16  }
 0x1a4   :  { %260 = vsyncadd [#allocation5], 4294967280 }
 0x1a5   :  { %195 = vsyncpa [#allocation4], 1 }
 0x1a6   :  { %196 = vsyncpa [#allocation5], 1 }

</bundles_post_ra>
